<compile_context>
chip_gen: v6e
topology: v6e:2x2x1
jax: 0.10.0
libtpu: 0.0.40
codegen_flags: <defaults>
</compile_context>

<pallas_src>
import jax
import jax.numpy as jnp
from jax import lax
from jax.experimental import pallas as pl
from jax.experimental.pallas import tpu as pltpu


BN_EPS = 1e-5
_VMEM_LIMIT_BYTES = 48 << 20   # scoped VMEM limit: headroom on v5e/v6e (128 MiB) & v7x (64 MiB)
_VMEM_TILE_BUDGET = 32 << 20   # target per-step double-buffered working set


def _round_up(a, b):
    return ((a + b - 1) // b) * b


def bnneck_head_kernel(x_ref, params_ref, o_ref):
    """Fused BN affine (+ identity dropout) on a (tN, C) row block.

    x_ref:      (tN, C) VMEM  features pre-sliced at spatial (0, 0)
    params_ref: (2,  C) VMEM  row 0 = scale = gamma * rsqrt(var + eps)
                              row 1 = shift = beta - mean * scale
    o_ref:      (tN, C) VMEM
    """
    x = x_ref[...].astype(jnp.float32)
    p = params_ref[...]                      # (2, C) f32
    y = x * p[0:1, :] + p[1:2, :]            # broadcast (1, C) over rows
    # Dropout is identity in eval mode.
    o_ref[...] = y.astype(o_ref.dtype)


def _choose_tile_n(N, C, in_bytes, out_bytes):
    """Largest row-tile that fits the double-buffered VMEM budget, with >=2
    parallel blocks when N is big enough (v7x megacore)."""
    if N <= 8:
        return N                              # block == full array dim: legal & single step
    bytes_per_row = 2 * C * (in_bytes + out_bytes)   # in + out, double-buffered
    tN = max(8, (_VMEM_TILE_BUDGET // max(bytes_per_row, 1)) // 8 * 8)
    tN = min(tN, _round_up(N, 8))
    if N >= 16:
        # Guarantee at least 2 "parallel" grid blocks so both v7x TCs get work.
        tN = min(tN, _round_up(pl.cdiv(N, 2), 8))
    return max(8, tN)


def bnneck_head_dropout(x, gamma, beta, running_mean, running_var):
    """x: (N, C, H, W); returns (N, C) in x.dtype. Eval-mode forward."""
    N, C, H, W = x.shape
    out_dtype = x.dtype

    # (0, 0) spatial slice outside the kernel: only N*C elements reach the kernel.
    # TODO(synk): on NCHW this slice is a strided HBM gather (stride = H*W*itemsize);
    # fixing it needs an NHWC producer or fusing the slice upstream — the kernel
    # cannot change the gather pattern.
    x00 = x[:, :, 0, 0]                                          # (N, C)

    # Fold the 4 BN vectors into a single (2, C) f32 params array.
    scale = gamma.astype(jnp.float32) * lax.rsqrt(
        running_var.astype(jnp.float32) + BN_EPS)                # (C,)
    shift = beta.astype(jnp.float32) - running_mean.astype(jnp.float32) * scale
    params = jnp.stack([scale, shift], axis=0)                   # (2, C)

    in_bytes = jnp.dtype(x00.dtype).itemsize
    out_bytes = jnp.dtype(out_dtype).itemsize
    tN = _choose_tile_n(N, C, in_bytes, out_bytes)
    grid = (pl.cdiv(N, tN),)

    return pl.pallas_call(
        bnneck_head_kernel,
        out_shape=jax.ShapeDtypeStruct((N, C), out_dtype),
        grid=grid,
        in_specs=[
            pl.BlockSpec((tN, C), lambda i: (i, 0)),   # row tiles, full channel dim
            pl.BlockSpec((2, C), lambda i: (0, 0)),    # params resident across steps
        ],
        out_specs=pl.BlockSpec((tN, C), lambda i: (i, 0)),
        compiler_params=pltpu.CompilerParams(
            dimension_semantics=("parallel",),
            vmem_limit_bytes=_VMEM_LIMIT_BYTES,
        ),
    )(x00, params)


def init_params(key, in_feat):
    """Deterministic BatchNorm2d params matching weights_init_kaiming:
       weight ~ N(1.0, 0.02), bias = 0, running_mean = 0, running_var = 1."""
    gamma = 1.0 + 0.02 * jax.random.normal(key, (in_feat,), dtype=jnp.float32)
    beta = jnp.zeros((in_feat,), dtype=jnp.float32)
    running_mean = jnp.zeros((in_feat,), dtype=jnp.float32)
    running_var = jnp.ones((in_feat,), dtype=jnp.float32)
    return gamma, beta, running_mean, running_var


if __name__ == "__main__":
    N, C, H, W = 2, 4, 16, 16  # batch=2, in_feat=4, spatial=16x16

    key = jax.random.PRNGKey(0)
    k_x, k_g = jax.random.split(key)
    x = jax.random.normal(k_x, (N, C, H, W), dtype=jnp.float32)
    gamma, beta, running_mean, running_var = init_params(k_g, C)

    out = bnneck_head_dropout(x, gamma, beta, running_mean, running_var)
    out = jax.block_until_ready(out)

    # Pure-JAX reference (eval-mode BN + identity dropout), compared in f32.
    ref = (x[:, :, 0, 0].astype(jnp.float32) - running_mean[None, :]) \
        / jnp.sqrt(running_var[None, :] + BN_EPS)
    ref = ref * gamma[None, :] + beta[None, :]
    assert out.shape == (N, C)
    assert jnp.allclose(out.astype(jnp.float32), ref, atol=1e-5, rtol=1e-5)

    print("KERNEL_OK")
</pallas_src>

<mosaic_0001>
module attributes {stable_mosaic.version = 11 : i64} {
  func.func @bnneck_head_kernel(%arg0: i32, %arg1: memref<2x4xf32, #tpu.memory_space<vmem>>, %arg2: memref<2x4xf32, #tpu.memory_space<vmem>>, %arg3: memref<2x4xf32, #tpu.memory_space<vmem>>) attributes {dimension_semantics = [#tpu.dimension_semantics<parallel>], iteration_bounds = array<i64: 1>, scalar_prefetch = 0 : i64, scratch_operands = 0 : i64, tpu.core_type = #tpu.core_type<tc>, window_params = [{transform_indices = @transform_0, window_bounds = array<i64: 2, 4>}, {pipeline_mode = #tpu.pipeline_mode<synchronous>, transform_indices = @transform_1, window_bounds = array<i64: 2, 4>}, {transform_indices = @transform_2, window_bounds = array<i64: 2, 4>}]} {
    %c0 = arith.constant 0 : index
    %c0_0 = arith.constant 0 : index
    %0 = vector.load %arg1[%c0, %c0_0] : memref<2x4xf32, #tpu.memory_space<vmem>>, vector<2x4xf32>
    %c0_1 = arith.constant 0 : index
    %c0_2 = arith.constant 0 : index
    %1 = vector.load %arg2[%c0_1, %c0_2] : memref<2x4xf32, #tpu.memory_space<vmem>>, vector<2x4xf32>
    %2 = vector.extract_strided_slice %1 {offsets = [0, 0], sizes = [1, 4], strides = [1, 1]} : vector<2x4xf32> to vector<1x4xf32>
    %3 = vector.broadcast %2 : vector<1x4xf32> to vector<2x4xf32>
    %4 = arith.mulf %0, %3 : vector<2x4xf32>
    %5 = vector.extract_strided_slice %1 {offsets = [1, 0], sizes = [1, 4], strides = [1, 1]} : vector<2x4xf32> to vector<1x4xf32>
    %6 = vector.broadcast %5 : vector<1x4xf32> to vector<2x4xf32>
    %7 = arith.addf %4, %6 : vector<2x4xf32>
    %c0_3 = arith.constant 0 : index
    %c0_4 = arith.constant 0 : index
    %8 = vector.load %arg3[%c0_3, %c0_4] : memref<2x4xf32, #tpu.memory_space<vmem>>, vector<2x4xf32>
    tpu.vector_store %arg3[%c0_3, %c0_4], %7 {strides = array<i32>} : memref<2x4xf32, #tpu.memory_space<vmem>>, vector<2x4xf32>,
    return
  }
  func.func @transform_0(%arg0: i32) -> (i32, i32) {
    %c0_i32 = arith.constant 0 : i32
    %c0_i32_0 = arith.constant 0 : i32
    return %arg0, %c0_i32 : i32, i32
  }
  func.func @transform_1(%arg0: i32) -> (i32, i32) {
    %c0_i32 = arith.constant 0 : i32
    %c0_i32_0 = arith.constant 0 : i32
    %c0_i32_1 = arith.constant 0 : i32
    return %c0_i32, %c0_i32_0 : i32, i32
  }
  func.func @transform_2(%arg0: i32) -> (i32, i32) {
    %c0_i32 = arith.constant 0 : i32
    %c0_i32_0 = arith.constant 0 : i32
    return %arg0, %c0_i32 : i32, i32
  }
}

</mosaic_0001>

<bundles_post_ra>
// kernel: tpu_custom_call.1
= control target key start
LH: loop header
LB: loop body
LE: loop exit
PB: predicated region body
PF: predicated region fallthrough
CT: control target
= control target key end

     0   :  { %7 = vsyncpa [#allocation3], 0  ;;  %s162_s0 = inlined_call_operand.hbm [shape: f32[2,4], index: 0, kind: input, shape index: {}]   ;;  %s163_s1 = inlined_call_operand.hbm [shape: f32[2,4], index: 1, kind: input, shape index: {}]   ;;  %s164_s2 = inlined_call_operand.hbm [shape: f32[2,4], index: 2, kind: output, shape index: {}]  }
   0x1   :  { %8 = vsyncpa [#allocation6], 0 }
   0x2   :  { %9 = vsyncpa [#allocation4], 0  ;;  %s135_s9 = smov [#allocation2]   ;;  %s136_s11 = smov [#allocation5]  }
   0x3   :  { %s16_s10 = sshll.u32 %s135_s9, 4  ;;  %s26_s12 = sshll.u32 %s136_s11, 4  ;;  %s17_s10 = int_to_ptr.vmem [resolvable:$true] %s16_s10  ;;  %s27_s12 = int_to_ptr.vmem [resolvable:$true] %s26_s12 }
   0x4   :  { %s77_s13 = scalar_lea.vmem %s17_s10, 32  ;;  %p82_p1 = scmp.lt.s32.totalorder %s17_s10, %s17_s10 }
   0x5   :  { %p78_p0 = scmp.ne.s32.totalorder %s17_s10, %s77_s13  ;;  %p83_p2 = scmp.lt.s32.totalorder %s77_s13, %s77_s13 }
   0x7   :  { %p84_p3 = por %p83_p2, %p82_p1 }
   0x9   :  { %p85_p4 = pnand %p84_p3, %p78_p0 }
   0xb   :  { %88 = shalt.err (!%p85_p4)
}
   0xc   :  { %19 = dma.hbm_to_vmem [thread:$0]  %s162_s0, 32, %s17_s10, [#allocation3]  }
   0xd   :  { %s97_s16 = scalar_lea.vmem %s27_s12, 32  ;;  %p102_p6 = scmp.lt.s32.totalorder %s27_s12, %s27_s12 }
   0xe   :  { %p98_p5 = scmp.ne.s32.totalorder %s27_s12, %s97_s16  ;;  %p103_p7 = scmp.lt.s32.totalorder %s97_s16, %s97_s16 }
  0x10   :  { %p104_p8 = por %p103_p7, %p102_p6 }
  0x12   :  { %p105_p9 = pnand %p104_p8, %p98_p5 }
  0x14   :  { %108 = shalt.err (!%p105_p9)
}
  0x15   :  { %29 = dma.hbm_to_vmem [thread:$0]  %s163_s1, 32, %s27_s12, [#allocation6]  }
  0x16   :  { %129 = dma.done.wait [#allocation3], 32  }
  0x17   :  { %130 = vsyncadd [#allocation3], 4294967264 }
  0x18   :  { %131 = dma.done.wait [#allocation6], 32  }
  0x19   :  { %132 = vsyncadd [#allocation6], 4294967264  ;;  %v38_v0 = vlaneseq  ;;  %v36_v4 = vld [vmem:[#allocation2] sm:$0x3]  ;;  %v37_v5 = vld [vmem:[#allocation5] sm:$0x3] }
  0x1a   :  { %s137_s0 = smov [#allocation7]   ;;  %vm48_vm0 = vcmask 25600  }
  0x1b   :  { %v39_v1 = vshrl.u32 %v38_v0, 7  ;;  %s56_s19 = sshll.u32 %s137_s0, 4  ;;  %s57_s19 = int_to_ptr.vmem [resolvable:$true] %s56_s19 }
  0x1c   :  { %s109_s1 = scalar_lea.vmem %s57_s19, 32  ;;  %p114_p11 = scmp.lt.s32.totalorder %s57_s19, %s57_s19 }
  0x1d   :  { %v40_v2 = vsub.s32 0, %v39_v1  ;;  %v45_v3 = vsub.s32 1, %v39_v1  ;;  %p110_p10 = scmp.ne.s32.totalorder %s57_s19, %s109_s1  ;;  %p115_p12 = scmp.lt.s32.totalorder %s109_s1, %s109_s1 }
  0x1f   :  { %v41_v6 = vrot.slane %v37_v5, %v40_v2  ;;  %v46_v7 = vrot.slane %v37_v5, %v45_v3  ;;  %p116_p13 = por %p115_p12, %p114_p11 }
  0x21   :  { %v42_v8 = vmul.f32 %v41_v6, %v36_v4  ;;  %p117_p0 = pnand %p116_p13, %p110_p10 }
  0x23   :  { %v47_v9 = vadd.f32 %v46_v7, %v42_v8 }
  0x25   :  { %49 = vst.msk [vmem:[#allocation7] sm:$0x3] %vm48_vm0, %v47_v9 }
  0x26   :  { %120 = shalt.err (!%p117_p0)
}
  0x27   :  { %59 = dma.vmem_to_hbm [thread:$0]  %s57_s19, 32, %s164_s2, [#allocation4]  }
  0x28   :  { %133 = dma.done.wait [#allocation4], 32  }
  0x29   :  { %134 = vsyncadd [#allocation4], 4294967264 }
  0x2a   :  { %63 = vsyncpa [#allocation3], 1 }
  0x2b   :  { %64 = vsyncpa [#allocation6], 1 }
  0x2c   :  { %65 = vsyncpa [#allocation4], 1 }

</bundles_post_ra>
